<compile_context>
chip_gen: v6e
topology: v6e:2x2x1
jax: 0.10.0
libtpu: 0.0.40
codegen_flags: <defaults>
</compile_context>

<pallas_src>
import functools

import jax
import jax.numpy as jnp
from jax.experimental import pallas as pl
from jax.experimental.pallas import tpu as pltpu

LANE = 128  # TPU lane width


def _round_up(x, m):
    return ((x + m - 1) // m) * m


def _ntm_kernel(ng_ref, doc_ref,
                w1_ref, b1_ref,
                w2_ref, b2_ref,
                w3_ref, b3_ref,
                score_ref, probs_ref):
    """One batch tile: (TB,E) bf16 embeddings in, (TB,128)/(TB,Lp) f32 out.

    Weights (bf16) and biases (f32) are whole-array blocks with constant
    index_maps, so they are fetched once and reused across all grid steps.
    """
    ng = ng_ref[...]        # (TB, E)  bf16
    doc = doc_ref[...]      # (TB, E)  bf16

    # ngram branch: sigmoid(ng @ W1 + b1)  — bf16 MXU, f32 accumulate.
    z1 = jnp.dot(ng, w1_ref[...], preferred_element_type=jnp.float32) + b1_ref[...]
    ngram_topic = jax.nn.sigmoid(z1)                                   # (TB, T) f32

    # document branch: softmax(doc @ W2 + b2, axis=-1)  in f32.
    z2 = jnp.dot(doc, w2_ref[...], preferred_element_type=jnp.float32) + b2_ref[...]
    z2 = z2 - jnp.max(z2, axis=-1, keepdims=True)
    e2 = jnp.exp(z2)
    inv_denom = pl.reciprocal(jnp.sum(e2, axis=-1, keepdims=True), approx=True)
    doc_topic = e2 * inv_denom                                         # (TB, T) f32

    # score = sum(ngram_topic * doc_topic, -1); broadcast across 128 lanes so
    # the store is a full unmasked vst (wrapper slices column 0).
    s = jnp.sum(ngram_topic * doc_topic, axis=-1, keepdims=True)       # (TB, 1)
    score_ref[...] = jnp.broadcast_to(s, score_ref.shape)              # (TB, 128)

    # label head: sigmoid(doc_topic @ W3 + b3), lane-padded to Lp (mult of 128).
    logits = jnp.dot(doc_topic.astype(jnp.bfloat16), w3_ref[...],
                     preferred_element_type=jnp.float32) + b3_ref[...]
    probs_ref[...] = jax.nn.sigmoid(logits)                            # (TB, Lp)


def prepare_params(params):
    """One-time host prep: bf16 weights, lane-padded label head, 2-D f32 biases."""
    T = params["w1"].shape[1]
    L = params["w3"].shape[1]
    Lp = _round_up(L, LANE)
    return {
        "w1": params["w1"].astype(jnp.bfloat16),                       # (E, T)
        "b1": params["b1"].reshape(1, T).astype(jnp.float32),
        "w2": params["w2"].astype(jnp.bfloat16),                       # (E, T)
        "b2": params["b2"].reshape(1, T).astype(jnp.float32),
        "w3": jnp.pad(params["w3"], ((0, 0), (0, Lp - L))).astype(jnp.bfloat16),  # (T, Lp)
        "b3": jnp.pad(params["b3"], (0, Lp - L)).reshape(1, Lp).astype(jnp.float32),
    }


@functools.partial(jax.jit, static_argnames=("num_labels", "block_b"))
def wiki_supervised_ntm_forward(ngram_embedding, document_embedding, prepared,
                                *, num_labels, block_b=128):
    """Forward pass. `prepared` comes from prepare_params (hoisted casts)."""
    B, E = ngram_embedding.shape
    T = prepared["w1"].shape[1]
    Lp = prepared["w3"].shape[1]

    # Batch tile: multiple of 8 sublanes; 128 by default for real workloads.
    TB = min(block_b, _round_up(max(B, 1), 8))
    B_pad = _round_up(B, TB)
    nb = B_pad // TB

    ng = ngram_embedding.astype(jnp.bfloat16)
    doc = document_embedding.astype(jnp.bfloat16)
    if B_pad != B:
        pad = ((0, B_pad - B), (0, 0))
        ng = jnp.pad(ng, pad)
        doc = jnp.pad(doc, pad)

    batch_spec = pl.BlockSpec((TB, E), lambda i: (i, 0))
    const = lambda shape: pl.BlockSpec(shape, lambda i: (0, 0))  # VMEM-resident

    flops = 2 * B_pad * (2 * E * T + T * Lp)
    transcendentals = B_pad * (2 * T + Lp + 1)
    bytes_accessed = (2 * B_pad * E * 2                     # bf16 embeddings
                      + (2 * E * T + T * Lp) * 2            # bf16 weights
                      + (2 * T + Lp) * 4                    # f32 biases
                      + B_pad * (LANE + Lp) * 4)            # f32 outputs

    score_slab, probs_pad = pl.pallas_call(
        _ntm_kernel,
        grid=(nb,),
        in_specs=[
            batch_spec,                # ngram embedding
            batch_spec,                # document embedding
            const((E, T)),             # w1
            const((1, T)),             # b1
            const((E, T)),             # w2
            const((1, T)),             # b2
            const((T, Lp)),            # w3 (lane-padded)
            const((1, Lp)),            # b3 (lane-padded)
        ],
        out_specs=(
            pl.BlockSpec((TB, LANE), lambda i: (i, 0)),     # score slab
            pl.BlockSpec((TB, Lp), lambda i: (i, 0)),       # label probs (padded)
        ),
        out_shape=(
            jax.ShapeDtypeStruct((B_pad, LANE), jnp.float32),
            jax.ShapeDtypeStruct((B_pad, Lp), jnp.float32),
        ),
        compiler_params=pltpu.CompilerParams(
            dimension_semantics=("parallel",)),             # 2 TCs on v7x
        cost_estimate=pl.CostEstimate(
            flops=flops,
            transcendentals=transcendentals,
            bytes_accessed=bytes_accessed),
    )(ng, doc,
      prepared["w1"], prepared["b1"],
      prepared["w2"], prepared["b2"],
      prepared["w3"], prepared["b3"])

    # Strip batch + lane padding.
    return score_slab[:B, 0], probs_pad[:B, :num_labels]


def init_params(key, embedding_dim, topic_dim, num_labels):
    """PyTorch-Linear-style init (U[-1/sqrt(fan_in), 1/sqrt(fan_in)]), f32 master."""
    ks = jax.random.split(key, 6)

    def lin(kw, kb, fan_in, fan_out):
        bound = 1.0 / jnp.sqrt(fan_in)
        w = jax.random.uniform(kw, (fan_in, fan_out), jnp.float32, -bound, bound)
        b = jax.random.uniform(kb, (fan_out,), jnp.float32, -bound, bound)
        return w, b

    w1, b1 = lin(ks[0], ks[1], embedding_dim, topic_dim)
    w2, b2 = lin(ks[2], ks[3], embedding_dim, topic_dim)
    w3, b3 = lin(ks[4], ks[5], topic_dim, num_labels)
    return {"w1": w1, "b1": b1, "w2": w2, "b2": b2, "w3": w3, "b3": b3}


def _reference_forward(ngram, doc, p):
    """Pure-JAX f32 reference for correctness check."""
    ngram_topic = jax.nn.sigmoid(ngram @ p["w1"] + p["b1"])
    doc_topic = jax.nn.softmax(doc @ p["w2"] + p["b2"], axis=-1)
    score = jnp.sum(ngram_topic * doc_topic, axis=-1)
    probs = jax.nn.sigmoid(doc_topic @ p["w3"] + p["b3"])
    return score, probs


if __name__ == "__main__":
    # Small shapes consistent with the module's forward semantics.
    batch = 4
    embedding_dim = 32
    topic_dim = 16
    num_labels = 8

    key = jax.random.PRNGKey(0)
    k_ng, k_doc, k_params = jax.random.split(key, 3)

    ngram_embedding = jax.random.normal(k_ng, (batch, embedding_dim), jnp.float32)
    document_embedding = jax.random.normal(k_doc, (batch, embedding_dim), jnp.float32)
    params = init_params(k_params, embedding_dim, topic_dim, num_labels)
    prepared = prepare_params(params)   # hoisted out of the per-call path

    score, label_probs = wiki_supervised_ntm_forward(
        ngram_embedding, document_embedding, prepared,
        num_labels=num_labels, block_b=128)
    jax.block_until_ready((score, label_probs))

    ref_score, ref_probs = _reference_forward(ngram_embedding, document_embedding, params)
    assert score.shape == (batch,)
    assert label_probs.shape == (batch, num_labels)
    # bf16 MXU operands + approx reciprocal -> loosened tolerance vs f32 reference.
    assert jnp.allclose(score, ref_score, atol=2e-2, rtol=2e-2), (score, ref_score)
    assert jnp.allclose(label_probs, ref_probs, atol=2e-2, rtol=2e-2), (label_probs, ref_probs)

    print("KERNEL_OK")
</pallas_src>

<mosaic_0001>
module attributes {stable_mosaic.version = 11 : i64} {
  func.func @_ntm_kernel(%arg0: i32, %arg1: memref<8x32xbf16, #tpu.memory_space<vmem>>, %arg2: memref<8x32xbf16, #tpu.memory_space<vmem>>, %arg3: memref<32x16xbf16, #tpu.memory_space<vmem>>, %arg4: memref<1x16xf32, #tpu.memory_space<vmem>>, %arg5: memref<32x16xbf16, #tpu.memory_space<vmem>>, %arg6: memref<1x16xf32, #tpu.memory_space<vmem>>, %arg7: memref<16x128xbf16, #tpu.memory_space<vmem>>, %arg8: memref<1x128xf32, #tpu.memory_space<vmem>>, %arg9: memref<8x128xf32, #tpu.memory_space<vmem>>, %arg10: memref<8x128xf32, #tpu.memory_space<vmem>>) attributes {dimension_semantics = [#tpu.dimension_semantics<parallel>], iteration_bounds = array<i64: 1>, scalar_prefetch = 0 : i64, scratch_operands = 0 : i64, tpu.core_type = #tpu.core_type<tc>, window_params = [{transform_indices = @transform_0, window_bounds = array<i64: 8, 32>}, {transform_indices = @transform_1, window_bounds = array<i64: 8, 32>}, {pipeline_mode = #tpu.pipeline_mode<synchronous>, transform_indices = @transform_2, window_bounds = array<i64: 32, 16>}, {pipeline_mode = #tpu.pipeline_mode<synchronous>, transform_indices = @transform_3, window_bounds = array<i64: 1, 16>}, {pipeline_mode = #tpu.pipeline_mode<synchronous>, transform_indices = @transform_4, window_bounds = array<i64: 32, 16>}, {pipeline_mode = #tpu.pipeline_mode<synchronous>, transform_indices = @transform_5, window_bounds = array<i64: 1, 16>}, {pipeline_mode = #tpu.pipeline_mode<synchronous>, transform_indices = @transform_6, window_bounds = array<i64: 16, 128>}, {pipeline_mode = #tpu.pipeline_mode<synchronous>, transform_indices = @transform_7, window_bounds = array<i64: 1, 128>}, {transform_indices = @transform_8, window_bounds = array<i64: 8, 128>}, {transform_indices = @transform_9, window_bounds = array<i64: 8, 128>}]} {
    %c0 = arith.constant 0 : index
    %c0_0 = arith.constant 0 : index
    %0 = vector.load %arg1[%c0, %c0_0] : memref<8x32xbf16, #tpu.memory_space<vmem>>, vector<8x32xbf16>
    %c0_1 = arith.constant 0 : index
    %c0_2 = arith.constant 0 : index
    %1 = vector.load %arg2[%c0_1, %c0_2] : memref<8x32xbf16, #tpu.memory_space<vmem>>, vector<8x32xbf16>
    %c0_3 = arith.constant 0 : index
    %c0_4 = arith.constant 0 : index
    %2 = vector.load %arg3[%c0_3, %c0_4] : memref<32x16xbf16, #tpu.memory_space<vmem>>, vector<32x16xbf16>
    %cst = arith.constant dense<0.000000e+00> : vector<8x16xf32>
    %3 = tpu.matmul %0, %2, %cst {dimension_numbers = #tpu.dot_dimension_numbers<[1], [0], [0], [1], [0, 0, 1, 1], [], []>} : vector<8x32xbf16>, vector<32x16xbf16>, vector<8x16xf32> -> vector<8x16xf32>
    %c0_5 = arith.constant 0 : index
    %c0_6 = arith.constant 0 : index
    %4 = vector.load %arg4[%c0_5, %c0_6] : memref<1x16xf32, #tpu.memory_space<vmem>>, vector<1x16xf32>
    %5 = vector.broadcast %4 : vector<1x16xf32> to vector<8x16xf32>
    %6 = arith.addf %3, %5 : vector<8x16xf32>
    %7 = arith.negf %6 : vector<8x16xf32>
    %8 = math.exp %7 : vector<8x16xf32>
    %cst_7 = arith.constant 1.000000e+00 : f32
    %9 = vector.broadcast %cst_7 : f32 to vector<8x16xf32>
    %10 = arith.addf %9, %8 : vector<8x16xf32>
    %11 = arith.divf %9, %10 : vector<8x16xf32>
    %c0_8 = arith.constant 0 : index
    %c0_9 = arith.constant 0 : index
    %12 = vector.load %arg5[%c0_8, %c0_9] : memref<32x16xbf16, #tpu.memory_space<vmem>>, vector<32x16xbf16>
    %cst_10 = arith.constant dense<0.000000e+00> : vector<8x16xf32>
    %13 = tpu.matmul %1, %12, %cst_10 {dimension_numbers = #tpu.dot_dimension_numbers<[1], [0], [0], [1], [0, 0, 1, 1], [], []>} : vector<8x32xbf16>, vector<32x16xbf16>, vector<8x16xf32> -> vector<8x16xf32>
    %c0_11 = arith.constant 0 : index
    %c0_12 = arith.constant 0 : index
    %14 = vector.load %arg6[%c0_11, %c0_12] : memref<1x16xf32, #tpu.memory_space<vmem>>, vector<1x16xf32>
    %15 = vector.broadcast %14 : vector<1x16xf32> to vector<8x16xf32>
    %16 = arith.addf %13, %15 : vector<8x16xf32>
    %cst_13 = arith.constant dense<0xFF800000> : vector<8xf32>
    %17 = vector.multi_reduction <maximumf>, %16, %cst_13 [1] : vector<8x16xf32> to vector<8xf32>
    %18 = vector.shape_cast %17 : vector<8xf32> to vector<8x1xf32>
    %19 = vector.broadcast %18 : vector<8x1xf32> to vector<8x16xf32>
    %20 = arith.subf %16, %19 : vector<8x16xf32>
    %21 = math.exp %20 : vector<8x16xf32>
    %cst_14 = arith.constant dense<0.000000e+00> : vector<8xf32>
    %22 = vector.multi_reduction <add>, %21, %cst_14 [1] : vector<8x16xf32> to vector<8xf32>
    %23 = vector.shape_cast %22 : vector<8xf32> to vector<8x1xf32>
    %24 = tpu.reciprocal %23 {approx = true} : vector<8x1xf32> -> vector<8x1xf32>
    %25 = vector.broadcast %24 : vector<8x1xf32> to vector<8x16xf32>
    %26 = arith.mulf %21, %25 : vector<8x16xf32>
    %27 = arith.mulf %11, %26 : vector<8x16xf32>
    %cst_15 = arith.constant dense<0.000000e+00> : vector<8xf32>
    %28 = vector.multi_reduction <add>, %27, %cst_15 [1] : vector<8x16xf32> to vector<8xf32>
    %29 = vector.shape_cast %28 : vector<8xf32> to vector<8x1xf32>
    %30 = vector.shape_cast %29 : vector<8x1xf32> to vector<8x1xf32>
    %31 = vector.broadcast %30 : vector<8x1xf32> to vector<8x128xf32>
    %c0_16 = arith.constant 0 : index
    %c0_17 = arith.constant 0 : index
    %32 = vector.load %arg9[%c0_16, %c0_17] : memref<8x128xf32, #tpu.memory_space<vmem>>, vector<8x128xf32>
    tpu.vector_store %arg9[%c0_16, %c0_17], %31 {strides = array<i32>} : memref<8x128xf32, #tpu.memory_space<vmem>>, vector<8x128xf32>,
    %33 = arith.truncf %26 : vector<8x16xf32> to vector<8x16xbf16>
    %c0_18 = arith.constant 0 : index
    %c0_19 = arith.constant 0 : index
    %34 = vector.load %arg7[%c0_18, %c0_19] : memref<16x128xbf16, #tpu.memory_space<vmem>>, vector<16x128xbf16>
    %cst_20 = arith.constant dense<0.000000e+00> : vector<8x128xf32>
    %35 = tpu.matmul %33, %34, %cst_20 {dimension_numbers = #tpu.dot_dimension_numbers<[1], [0], [0], [1], [0, 0, 1, 1], [], []>} : vector<8x16xbf16>, vector<16x128xbf16>, vector<8x128xf32> -> vector<8x128xf32>
    %c0_21 = arith.constant 0 : index
    %c0_22 = arith.constant 0 : index
    %36 = vector.load %arg8[%c0_21, %c0_22] : memref<1x128xf32, #tpu.memory_space<vmem>>, vector<1x128xf32>
    %37 = vector.broadcast %36 : vector<1x128xf32> to vector<8x128xf32>
    %38 = arith.addf %35, %37 : vector<8x128xf32>
    %39 = arith.negf %38 : vector<8x128xf32>
    %40 = math.exp %39 : vector<8x128xf32>
    %cst_23 = arith.constant 1.000000e+00 : f32
    %41 = vector.broadcast %cst_23 : f32 to vector<8x128xf32>
    %42 = arith.addf %41, %40 : vector<8x128xf32>
    %43 = arith.divf %41, %42 : vector<8x128xf32>
    %c0_24 = arith.constant 0 : index
    %c0_25 = arith.constant 0 : index
    %44 = vector.load %arg10[%c0_24, %c0_25] : memref<8x128xf32, #tpu.memory_space<vmem>>, vector<8x128xf32>
    tpu.vector_store %arg10[%c0_24, %c0_25], %43 {strides = array<i32>} : memref<8x128xf32, #tpu.memory_space<vmem>>, vector<8x128xf32>,
    return
  }
  func.func @transform_0(%arg0: i32) -> (i32, i32) {
    %c0_i32 = arith.constant 0 : i32
    %c0_i32_0 = arith.constant 0 : i32
    return %arg0, %c0_i32 : i32, i32
  }
  func.func @transform_1(%arg0: i32) -> (i32, i32) {
    %c0_i32 = arith.constant 0 : i32
    %c0_i32_0 = arith.constant 0 : i32
    return %arg0, %c0_i32 : i32, i32
  }
  func.func @transform_2(%arg0: i32) -> (i32, i32) {
    %c0_i32 = arith.constant 0 : i32
    %c0_i32_0 = arith.constant 0 : i32
    %c0_i32_1 = arith.constant 0 : i32
    return %c0_i32, %c0_i32_0 : i32, i32
  }
  func.func @transform_3(%arg0: i32) -> (i32, i32) {
    %c0_i32 = arith.constant 0 : i32
    %c0_i32_0 = arith.constant 0 : i32
    %c0_i32_1 = arith.constant 0 : i32
    return %c0_i32, %c0_i32_0 : i32, i32
  }
  func.func @transform_4(%arg0: i32) -> (i32, i32) {
    %c0_i32 = arith.constant 0 : i32
    %c0_i32_0 = arith.constant 0 : i32
    %c0_i32_1 = arith.constant 0 : i32
    return %c0_i32, %c0_i32_0 : i32, i32
  }
  func.func @transform_5(%arg0: i32) -> (i32, i32) {
    %c0_i32 = arith.constant 0 : i32
    %c0_i32_0 = arith.constant 0 : i32
    %c0_i32_1 = arith.constant 0 : i32
    return %c0_i32, %c0_i32_0 : i32, i32
  }
  func.func @transform_6(%arg0: i32) -> (i32, i32) {
    %c0_i32 = arith.constant 0 : i32
    %c0_i32_0 = arith.constant 0 : i32
    %c0_i32_1 = arith.constant 0 : i32
    return %c0_i32, %c0_i32_0 : i32, i32
  }
  func.func @transform_7(%arg0: i32) -> (i32, i32) {
    %c0_i32 = arith.constant 0 : i32
    %c0_i32_0 = arith.constant 0 : i32
    %c0_i32_1 = arith.constant 0 : i32
    return %c0_i32, %c0_i32_0 : i32, i32
  }
  func.func @transform_8(%arg0: i32) -> (i32, i32) {
    %c0_i32 = arith.constant 0 : i32
    %c0_i32_0 = arith.constant 0 : i32
    return %arg0, %c0_i32 : i32, i32
  }
  func.func @transform_9(%arg0: i32) -> (i32, i32) {
    %c0_i32 = arith.constant 0 : i32
    %c0_i32_0 = arith.constant 0 : i32
    return %arg0, %c0_i32 : i32, i32
  }
}

</mosaic_0001>

<bundles_post_ra>
// kernel: wiki_supervised_ntm_forward.1
= control target key start
LH: loop header
LB: loop body
LE: loop exit
PB: predicated region body
PF: predicated region fallthrough
CT: control target
= control target key end

     0   :  { %v326_v0 = vmov 0.0   ;;  %vm327_vm0 = vmmov 0   ;;  %vm57_vm1 = vcmask 261120   ;;  %vm173_vm2 = vcmask 130048   ;;  %s421_s4 = inlined_call_operand.vmem [shape: bf16[32,16], index: 4, kind: input, shape index: {}]   ;;  %s422_s1 = inlined_call_operand.vmem [shape: bf16[8,32], index: 1, kind: input, shape index: {}]   ;;  %s423_s2 = inlined_call_operand.vmem [shape: bf16[32,16], index: 2, kind: input, shape index: {}]   ;;  %s424_s0 = inlined_call_operand.vmem [shape: bf16[8,32], index: 0, kind: input, shape index: {}]   ;;  %s425_s5 = inlined_call_operand.vmem [shape: f32[1,16], index: 5, kind: input, shape index: {}]   ;;  %s426_s6 = inlined_call_operand.vmem [shape: bf16[16,128], index: 6, kind: input, shape index: {}]   ;;  %s427_s3 = inlined_call_operand.vmem [shape: f32[1,16], index: 3, kind: input, shape index: {}]   ;;  %s428_s8 = inlined_call_operand.vmem [shape: f32[8,128], index: 8, kind: output, shape index: {0}]   ;;  %s429_s7 = inlined_call_operand.vmem [shape: f32[1,128], index: 7, kind: input, shape index: {}]   ;;  %s430_s9 = inlined_call_operand.vmem [shape: f32[8,128], index: 9, kind: output, shape index: {1}]  }
   0x1   :  { %293 = vmatprep.subr.bf16.mxu1 %v326_v0  ;;  %v309_v1 = vld [vmem:[%s421_s4 + $0x8] sm:$0xff]   ;;  %297 = vmatprep.mubr.msk.bf16.mxu1 %vm327_vm0, %v326_v0  ;;  %v310_v2 = vld [vmem:[%s421_s4] sm:$0xff]  }
   0x2   :  { %285 = vmatprep.subr.bf16.mxu0 %v326_v0  ;;  %289 = vmatprep.mubr.msk.bf16.mxu0 %vm327_vm0, %v326_v0  ;;  %v33_v3 = vld [vmem:[%s422_s1] sm:$0xf]  ;;  %v311_v4 = vld [vmem:[%s423_s2 + $0x8] sm:$0xff]  }
   0x3   :  { %294 = vmatpush3.bf16.msra.mxu1 %v309_v1  ;;  %286 = vmatpush3.bf16.msra.mxu0 %v311_v4  ;;  %v312_v5 = vld [vmem:[%s423_s2] sm:$0xff]  }
   0x4   :  { %295 = vmatprep.subr.bf16.mxu1 %v326_v0  ;;  %287 = vmatprep.subr.bf16.mxu0 %v326_v0  ;;  %v32_v6 = vld [vmem:[%s424_s0] sm:$0xf] }
   0x5   :  { %v269_v7 = vld [vmem:[%s425_s5] ss:$0 sm:$0xff] }
   0x6   :  { %v313_v23 = vld [vmem:[%s426_s6] sm:$0xff]  }
   0x7   :  { %296 = vmatpush3.bf16.msra.mxu1 %v310_v2  ;;  %288 = vmatpush3.bf16.msra.mxu0 %v312_v5  ;;  %v264_v24 = vld [vmem:[%s427_s3] ss:$0 sm:$0xff] }
   0x8   :  { %301 = vmatprep.subr.bf16.mxu0 %v326_v0  ;;  %v273_v37 = vld [vmem:[%s429_s7] ss:$0 sm:$0xff] }
   0xa   :  { %298 = vmatmul.mubr.msk.bf16.vlgmr.msra.gmra.mxu1 %vm57_vm1, %v33_v3  ;;  %290 = vmatmul.mubr.msk.bf16.vlgmr.msra.gmra.mxu0 %vm57_vm1, %v32_v6 }
   0xb   :  { %303 = vmatprep.mubr.msk.bf16.mxu0 %vm327_vm0, %v326_v0  ;;  %302 = vmatpush3.bf16.msra.mxu0 %v313_v23 }
  0xca   :  { %v167_v8 = vpop.f32.mrf.mxu1  ;;  %v95_v14 = vpop.f32.mrf.mxu0 }
  0xcb   :  { %v168_v9 = vadd.f32 %v269_v7, %v167_v8  ;;  %v96_v25 = vadd.f32 %v264_v24, %v95_v14 }
  0xcc   :  { %v299_v10 = vpop.f32.mrf.mxu1  ;;  %v291_v15 = vpop.f32.mrf.mxu0 }
  0xcd   :  { %v174_v11 = vsel %vm173_vm2, %v168_v9, -inf  ;;  %v268_v26 = vmul.f32 -1.442695, %v96_v25 }
  0xce   :  { %175 = vmax.xlane.f32.xlu0 %v174_v11  ;;  %v170_v12 = vpop.f32.mrf.mxu1  ;;  %v98_v16 = vpop.f32.mrf.mxu0 }
  0xd0   :  { %v300_v13 = vpop.f32.mrf.mxu1  ;;  %v292_v17 = vpop.f32.mrf.mxu0 }
 0x157   :  { %v176_v18 = vpop.xlane.xlu0 %175 }
 0x158   :  { %v177_v19 = vsub.f32 %v168_v9, %v176_v18 }
 0x15a   :  { %v178_v20 = vmul.f32 1.442695, %v177_v19 }
 0x15c   :  { %314 = vpow2.f32 %v178_v20 }
 0x15d   :  { %316 = vpow2.f32 %v268_v26 }
 0x169   :  { %v315_v21 = vpop.eup %314 }
 0x16a   :  { %v180_v22 = vsel %vm173_vm2, %v315_v21, 0.0  ;;  %v317_v27 = vpop.eup %316 }
 0x16b   :  { %181 = vadd.xlane.f32.xlu0 %v180_v22  ;;  %v104_v28 = vadd.f32 1.0, %v317_v27 }
 0x16d   :  { %318 = vrcp.f32 %v104_v28 }
 0x17a   :  { %v319_v30 = vpop.eup %318 }
 0x1f4   :  { %v182_v29 = vpop.xlane.xlu0 %181 }
 0x1f5   :  { %320 = vrcp.f32 %v182_v29 }
 0x202   :  { %v321_v31 = vpop.eup %320 }
 0x203   :  { %v184_v32 = vmul.f32 %v321_v31, %v315_v21 }
 0x205   :  { %v190_v33 = vpack.c.bf16 %v184_v32, %v184_v32  ;;  %v185_v34 = vmul.f32 %v319_v30, %v184_v32 }
 0x207   :  { %304 = vmatmul.mubr.msk.bf16.vlgmr.msra.gmra.mxu0 %vm173_vm2, %v190_v33  ;;  %v186_v35 = vsel %vm173_vm2, %v185_v34, 0.0 }
 0x208   :  { %187 = vadd.xlane.f32.xlu1 %v186_v35 }
 0x291   :  { %v188_v36 = vpop.xlane.xlu1 %187 }
 0x292   :  { %189 = vst [vmem:[%s428_s8] sm:$0xff] %v188_v36 }
 0x2c7   :  { %v243_v38 = vpop.f32.mrf.mxu0 }
 0x2c8   :  { %v244_v39 = vadd.f32 %v273_v37, %v243_v38 }
 0x2c9   :  { %v305_v40 = vpop.f32.mrf.mxu0 }
 0x2ca   :  { %v276_v41 = vmul.f32 -1.442695, %v244_v39 }
 0x2cb   :  { %v246_v42 = vpop.f32.mrf.mxu0 }
 0x2cc   :  { %322 = vpow2.f32 %v276_v41 }
 0x2cd   :  { %v306_v43 = vpop.f32.mrf.mxu0 }
 0x2d9   :  { %v323_v44 = vpop.eup %322 }
 0x2da   :  { %v252_v45 = vadd.f32 1.0, %v323_v44 }
 0x2dc   :  { %324 = vrcp.f32 %v252_v45 }
 0x2e9   :  { %v325_v46 = vpop.eup %324 }
 0x2ea   :  { %255 = vst [vmem:[%s430_s9] sm:$0xff] %v325_v46 }

</bundles_post_ra>
